<compile_context>
chip_gen: v7x
topology: tpu7x:2x2x1
jax: 0.10.0
libtpu: 0.0.40
codegen_flags: <defaults>
</compile_context>

<pallas_src>
import functools
import math

import jax
import jax.numpy as jnp
from jax.experimental import pallas as pl
from jax.experimental.pallas import tpu as pltpu


def _round_up(a, b):
    return (a + b - 1) // b * b


def _aligned_tile(dim, max_tile):
    """Largest multiple of 128 that divides `dim` and is <= max_tile (None if dim % 128 != 0)."""
    if dim % 128 != 0:
        return None
    best = None
    g = dim // 128
    for cand in range(1, g + 1):
        if g % cand == 0 and cand * 128 <= max_tile:
            best = cand * 128
    return best


def _geglu_kernel(x_ref, wx_ref, wg_ref, bx_ref, bg_ref, o_ref,
                  acc_x, acc_g, *, approximate, compute_dtype):
    k = pl.program_id(2)

    # Fold the bias add into the accumulator init (one tn-wide broadcast per
    # output tile instead of a full-width VPU add after the matmul).
    @pl.when(k == 0)
    def _init():
        acc_x[...] = jnp.broadcast_to(bx_ref[...].astype(jnp.float32), acc_x.shape)
        acc_g[...] = jnp.broadcast_to(bg_ref[...].astype(jnp.float32), acc_g.shape)

    xv = x_ref[...]
    wxv = wx_ref[...]
    wgv = wg_ref[...]
    if compute_dtype is not None:
        # bf16 MXU path (v6e/v7x native rate); accumulation stays f32.
        xv = xv.astype(compute_dtype)
        wxv = wxv.astype(compute_dtype)
        wgv = wgv.astype(compute_dtype)
    acc_x[...] += jnp.dot(xv, wxv, preferred_element_type=jnp.float32)
    acc_g[...] += jnp.dot(xv, wgv, preferred_element_type=jnp.float32)

    @pl.when(k == pl.num_programs(2) - 1)
    def _finalize():
        gate = acc_g[...]
        if approximate:
            # tanh-approximate GELU (single EUP op); opt-in — changes numerics
            # vs torch.nn.GELU() exact mode.
            c = math.sqrt(2.0 / math.pi)
            gelu = 0.5 * gate * (1.0 + jnp.tanh(c * (gate + 0.044715 * gate * gate * gate)))
        else:
            # Exact erf GELU (matches torch.nn.GELU() default).
            gelu = 0.5 * gate * (1.0 + jax.lax.erf(gate * (1.0 / math.sqrt(2.0))))
        o_ref[...] = (acc_x[...] * gelu).astype(o_ref.dtype)


def geglu(x, w, b, *, block_m=512, block_n=512, block_k=512,
          approximate=False, compute_dtype=None):
    """GEGLU forward.

    x: (..., dim_in)
    w: (dim_in, 2*dim_out)   -- transpose of the PyTorch nn.Linear weight
    b: (2*dim_out,)
    returns: (..., dim_out)
    """
    orig_shape = x.shape
    dim_in = orig_shape[-1]
    two_dim_out = w.shape[-1]
    dim_out = two_dim_out // 2

    x2d = x.reshape(-1, dim_in)
    m = x2d.shape[0]

    # Sublane multiple depends on dtype (f32 -> 8, bf16 -> 16).
    sub = 16 if x.dtype == jnp.bfloat16 else 8

    # Prefer tile sizes that evenly divide dim_in / dim_out so the original
    # weight can be fed directly via block-offset index_maps (no HBM copy).
    tk = _aligned_tile(dim_in, block_k)
    tn = _aligned_tile(dim_out, block_n)
    no_copy = (tk is not None) and (tn is not None)
    if tk is None:
        tk = min(block_k, _round_up(dim_in, 128))
    if tn is None:
        tn = min(block_n, _round_up(dim_out, 128))

    tm = min(block_m, _round_up(m, sub))
    mp = _round_up(m, tm)
    np_ = _round_up(dim_out, tn)
    kp = _round_up(dim_in, tk)

    # v7x megacore: keep >= 2 parallel output tiles so both TensorCores get work.
    if (mp // tm) * (np_ // tn) < 2 and tm > sub:
        tm = max(sub, _round_up((mp + 1) // 2, sub))
        mp = _round_up(m, tm)

    # Zero-pad ragged activation dims (padding contributes 0; padded output is
    # sliced off below). Cheap: activations only, never the weight in the
    # aligned (common) case.
    if (mp, kp) != (m, dim_in):
        x2d = jnp.pad(x2d, ((0, mp - m), (0, kp - dim_in)))

    if no_copy:
        w2 = w                              # (kp, 2*np_) == (dim_in, 2*dim_out)
        b2 = b.reshape(1, two_dim_out)      # metadata-only reshape
    else:
        # Ragged dim_in/dim_out: one-time repack so the x half lives in
        # columns [0, np_) and the gate half in [np_, 2*np_).
        w2 = jnp.zeros((kp, 2 * np_), dtype=w.dtype)
        w2 = w2.at[:dim_in, :dim_out].set(w[:, :dim_out])
        w2 = w2.at[:dim_in, np_:np_ + dim_out].set(w[:, dim_out:])
        b2 = jnp.zeros((1, 2 * np_), dtype=b.dtype)
        b2 = b2.at[0, :dim_out].set(b[:dim_out])
        b2 = b2.at[0, np_:np_ + dim_out].set(b[dim_out:])

    goff = np_ // tn                        # gate-half block offset along N
    grid = (mp // tm, np_ // tn, kp // tk)
    grid_m, grid_n, grid_k = grid

    in_item = jnp.dtype(x.dtype).itemsize
    w_item = jnp.dtype(w.dtype).itemsize
    out_item = in_item

    # Advisory cost: reflect actual grid traffic (x re-read per N tile,
    # weights/bias re-read per M tile).
    cost = pl.CostEstimate(
        flops=2 * mp * kp * (2 * np_),
        transcendentals=mp * np_,
        bytes_accessed=(grid_n * mp * kp * in_item
                        + grid_m * kp * 2 * np_ * w_item
                        + grid_m * 2 * np_ * w_item
                        + mp * np_ * out_item),
    )

    # VMEM footprint: double-buffered x + 2 weight tiles + 2 bias rows + out
    # tile, plus the two f32 accumulators; set the limit explicitly so large
    # tiles don't trip the per-generation scoped defaults.
    acc_bytes = 2 * tm * tn * 4
    buf_bytes = 2 * (tm * tk * in_item + 2 * tk * tn * w_item
                     + 2 * tn * w_item + tm * tn * out_item)
    vmem_limit = int(min(128 << 20, max(32 << 20, acc_bytes + buf_bytes + (4 << 20))))

    out = pl.pallas_call(
        functools.partial(_geglu_kernel, approximate=approximate,
                          compute_dtype=compute_dtype),
        out_shape=jax.ShapeDtypeStruct((mp, np_), x.dtype),
        grid_spec=pltpu.PrefetchScalarGridSpec(
            num_scalar_prefetch=0,
            grid=grid,
            in_specs=[
                pl.BlockSpec((tm, tk), lambda i, j, k: (i, k)),          # x tile
                pl.BlockSpec((tk, tn), lambda i, j, k: (k, j)),          # w, x half
                pl.BlockSpec((tk, tn), lambda i, j, k: (k, j + goff)),   # w, gate half
                pl.BlockSpec((1, tn), lambda i, j, k: (0, j)),           # b, x half
                pl.BlockSpec((1, tn), lambda i, j, k: (0, j + goff)),    # b, gate half
            ],
            out_specs=pl.BlockSpec((tm, tn), lambda i, j, k: (i, j)),
            scratch_shapes=[
                pltpu.VMEM((tm, tn), jnp.float32),  # acc for x half
                pltpu.VMEM((tm, tn), jnp.float32),  # acc for gate half
            ],
        ),
        compiler_params=pltpu.CompilerParams(
            dimension_semantics=("parallel", "parallel", "arbitrary"),
            vmem_limit_bytes=vmem_limit,
        ),
        cost_estimate=cost,
    )(x2d, w2, w2, b2, b2)   # same buffer passed twice: no copy, two views

    out = out[:m, :dim_out]
    return out.reshape(*orig_shape[:-1], dim_out)


def geglu_reference(x, w, b):
    proj = jnp.einsum("...i,io->...o", x, w,
                      preferred_element_type=jnp.float32) + b.astype(jnp.float32)
    dim_out = w.shape[-1] // 2
    x_part, gate = proj[..., :dim_out], proj[..., dim_out:]
    return (x_part * 0.5 * gate * (1.0 + jax.lax.erf(gate / math.sqrt(2.0)))).astype(x.dtype)


def _make_inputs(key, batch, seq, dim_in, dim_out, dtype=jnp.float32):
    k1, k2, k3 = jax.random.split(key, 3)
    x = jax.random.normal(k1, (batch, seq, dim_in), dtype=dtype)
    bound = 1.0 / math.sqrt(dim_in)
    w = jax.random.uniform(k2, (dim_in, 2 * dim_out), dtype, -bound, bound)
    b = jax.random.uniform(k3, (2 * dim_out,), dtype, -bound, bound)
    return x, w, b


if __name__ == "__main__":
    key = jax.random.PRNGKey(0)
    k1, k2, k3 = jax.random.split(key, 3)

    # Test 1: small ragged dims (exercises repack/padding fallback + megacore
    # occupancy split of M).
    x, w, b = _make_inputs(k1, batch=2, seq=8, dim_in=32, dim_out=32)
    out = jax.block_until_ready(geglu(x, w, b))
    ref = geglu_reference(x, w, b)
    assert out.shape == (2, 8, 32)
    assert jnp.allclose(out, ref, atol=1e-5, rtol=1e-5), "mismatch vs. reference (test 1)"

    # Test 2: aligned dims with small blocks (exercises the no-copy weight path
    # with gate block-offset > 1 and a multi-step K accumulator).
    x, w, b = _make_inputs(k2, batch=2, seq=32, dim_in=256, dim_out=256)
    out = jax.block_until_ready(geglu(x, w, b, block_m=64, block_n=128, block_k=128))
    ref = geglu_reference(x, w, b)
    assert out.shape == (2, 32, 256)
    assert jnp.allclose(out, ref, atol=1e-4, rtol=1e-4), "mismatch vs. reference (test 2)"

    # Test 3: aligned dims with default (large) blocks — single K step, so
    # bias-init and gating epilogue compose in the same grid iteration.
    x, w, b = _make_inputs(k3, batch=2, seq=64, dim_in=256, dim_out=256)
    out = jax.block_until_ready(geglu(x, w, b))
    ref = geglu_reference(x, w, b)
    assert out.shape == (2, 64, 256)
    assert jnp.allclose(out, ref, atol=1e-4, rtol=1e-4), "mismatch vs. reference (test 3)"

    print("KERNEL_OK")
</pallas_src>

<mosaic_0001>
module attributes {stable_mosaic.version = 11 : i64} {
  func.func @_geglu_kernel(%arg0: i32, %arg1: i32, %arg2: i32, %arg3: memref<8x128xf32, #tpu.memory_space<vmem>>, %arg4: memref<128x128xf32, #tpu.memory_space<vmem>>, %arg5: memref<128x128xf32, #tpu.memory_space<vmem>>, %arg6: memref<1x128xf32, #tpu.memory_space<vmem>>, %arg7: memref<1x128xf32, #tpu.memory_space<vmem>>, %arg8: memref<8x128xf32, #tpu.memory_space<vmem>>, %arg9: memref<8x128xf32, #tpu.memory_space<vmem>>, %arg10: memref<8x128xf32, #tpu.memory_space<vmem>>) attributes {dimension_semantics = [#tpu.dimension_semantics<parallel>, #tpu.dimension_semantics<parallel>, #tpu.dimension_semantics<arbitrary>], iteration_bounds = array<i64: 2, 1, 1>, scalar_prefetch = 0 : i64, scratch_operands = 2 : i64, tpu.core_type = #tpu.core_type<tc>, window_params = [{transform_indices = @transform_0, window_bounds = array<i64: 8, 128>}, {transform_indices = @transform_1, window_bounds = array<i64: 128, 128>}, {transform_indices = @transform_2, window_bounds = array<i64: 128, 128>}, {transform_indices = @transform_3, window_bounds = array<i64: 1, 128>}, {transform_indices = @transform_4, window_bounds = array<i64: 1, 128>}, {transform_indices = @transform_5, window_bounds = array<i64: 8, 128>}]} {
    %c0_i32 = arith.constant 0 : i32
    %0 = arith.cmpi eq, %arg2, %c0_i32 : i32
    %1 = arith.extui %0 : i1 to i32
    %c0_i32_0 = arith.constant 0 : i32
    %2 = arith.cmpi ne, %1, %c0_i32_0 : i32
    scf.if %2 {
      %c0_17 = arith.constant 0 : index
      %c0_18 = arith.constant 0 : index
      %17 = vector.load %arg6[%c0_17, %c0_18] : memref<1x128xf32, #tpu.memory_space<vmem>>, vector<1x128xf32>
      %18 = vector.shape_cast %17 : vector<1x128xf32> to vector<1x128xf32>
      %19 = vector.broadcast %18 : vector<1x128xf32> to vector<8x128xf32>
      %c0_19 = arith.constant 0 : index
      %c0_20 = arith.constant 0 : index
      %20 = vector.load %arg9[%c0_19, %c0_20] : memref<8x128xf32, #tpu.memory_space<vmem>>, vector<8x128xf32>
      tpu.vector_store %arg9[%c0_19, %c0_20], %19 {strides = array<i32>} : memref<8x128xf32, #tpu.memory_space<vmem>>, vector<8x128xf32>,
      %c0_21 = arith.constant 0 : index
      %c0_22 = arith.constant 0 : index
      %21 = vector.load %arg7[%c0_21, %c0_22] : memref<1x128xf32, #tpu.memory_space<vmem>>, vector<1x128xf32>
      %22 = vector.shape_cast %21 : vector<1x128xf32> to vector<1x128xf32>
      %23 = vector.broadcast %22 : vector<1x128xf32> to vector<8x128xf32>
      %c0_23 = arith.constant 0 : index
      %c0_24 = arith.constant 0 : index
      %24 = vector.load %arg10[%c0_23, %c0_24] : memref<8x128xf32, #tpu.memory_space<vmem>>, vector<8x128xf32>
      tpu.vector_store %arg10[%c0_23, %c0_24], %23 {strides = array<i32>} : memref<8x128xf32, #tpu.memory_space<vmem>>, vector<8x128xf32>,
    } else {
    }
    %c0 = arith.constant 0 : index
    %c0_1 = arith.constant 0 : index
    %3 = vector.load %arg3[%c0, %c0_1] : memref<8x128xf32, #tpu.memory_space<vmem>>, vector<8x128xf32>
    %c0_2 = arith.constant 0 : index
    %c0_3 = arith.constant 0 : index
    %4 = vector.load %arg4[%c0_2, %c0_3] : memref<128x128xf32, #tpu.memory_space<vmem>>, vector<128x128xf32>
    %c0_4 = arith.constant 0 : index
    %c0_5 = arith.constant 0 : index
    %5 = vector.load %arg5[%c0_4, %c0_5] : memref<128x128xf32, #tpu.memory_space<vmem>>, vector<128x128xf32>
    %c0_6 = arith.constant 0 : index
    %c0_7 = arith.constant 0 : index
    %6 = vector.load %arg9[%c0_6, %c0_7] : memref<8x128xf32, #tpu.memory_space<vmem>>, vector<8x128xf32>
    %cst = arith.constant dense<0.000000e+00> : vector<8x128xf32>
    %7 = tpu.matmul %3, %4, %cst {dimension_numbers = #tpu.dot_dimension_numbers<[1], [0], [0], [1], [0, 0, 1, 1], [], []>} : vector<8x128xf32>, vector<128x128xf32>, vector<8x128xf32> -> vector<8x128xf32>
    %8 = arith.addf %6, %7 : vector<8x128xf32>
    %c0_8 = arith.constant 0 : index
    %c0_9 = arith.constant 0 : index
    %9 = vector.load %arg9[%c0_8, %c0_9] : memref<8x128xf32, #tpu.memory_space<vmem>>, vector<8x128xf32>
    tpu.vector_store %arg9[%c0_8, %c0_9], %8 {strides = array<i32>} : memref<8x128xf32, #tpu.memory_space<vmem>>, vector<8x128xf32>,
    %c0_10 = arith.constant 0 : index
    %c0_11 = arith.constant 0 : index
    %10 = vector.load %arg10[%c0_10, %c0_11] : memref<8x128xf32, #tpu.memory_space<vmem>>, vector<8x128xf32>
    %cst_12 = arith.constant dense<0.000000e+00> : vector<8x128xf32>
    %11 = tpu.matmul %3, %5, %cst_12 {dimension_numbers = #tpu.dot_dimension_numbers<[1], [0], [0], [1], [0, 0, 1, 1], [], []>} : vector<8x128xf32>, vector<128x128xf32>, vector<8x128xf32> -> vector<8x128xf32>
    %12 = arith.addf %10, %11 : vector<8x128xf32>
    %c0_13 = arith.constant 0 : index
    %c0_14 = arith.constant 0 : index
    %13 = vector.load %arg10[%c0_13, %c0_14] : memref<8x128xf32, #tpu.memory_space<vmem>>, vector<8x128xf32>
    tpu.vector_store %arg10[%c0_13, %c0_14], %12 {strides = array<i32>} : memref<8x128xf32, #tpu.memory_space<vmem>>, vector<8x128xf32>,
    %c0_i32_15 = arith.constant 0 : i32
    %14 = arith.cmpi eq, %arg2, %c0_i32_15 : i32
    %15 = arith.extui %14 : i1 to i32
    %c0_i32_16 = arith.constant 0 : i32
    %16 = arith.cmpi ne, %15, %c0_i32_16 : i32
    scf.if %16 {
      %c0_17 = arith.constant 0 : index
      %c0_18 = arith.constant 0 : index
      %17 = vector.load %arg10[%c0_17, %c0_18] : memref<8x128xf32, #tpu.memory_space<vmem>>, vector<8x128xf32>
      %cst_19 = arith.constant 5.000000e-01 : f32
      %18 = vector.broadcast %cst_19 : f32 to vector<8x128xf32>
      %19 = arith.mulf %18, %17 : vector<8x128xf32>
      %cst_20 = arith.constant 0.707106769 : f32
      %20 = vector.broadcast %cst_20 : f32 to vector<8x128xf32>
      %21 = arith.mulf %17, %20 : vector<8x128xf32>
      %22 = math.erf %21 : vector<8x128xf32>
      %cst_21 = arith.constant 1.000000e+00 : f32
      %23 = vector.broadcast %cst_21 : f32 to vector<8x128xf32>
      %24 = arith.addf %23, %22 : vector<8x128xf32>
      %25 = arith.mulf %19, %24 : vector<8x128xf32>
      %c0_22 = arith.constant 0 : index
      %c0_23 = arith.constant 0 : index
      %26 = vector.load %arg9[%c0_22, %c0_23] : memref<8x128xf32, #tpu.memory_space<vmem>>, vector<8x128xf32>
      %27 = arith.mulf %26, %25 : vector<8x128xf32>
      %c0_24 = arith.constant 0 : index
      %c0_25 = arith.constant 0 : index
      %28 = vector.load %arg8[%c0_24, %c0_25] : memref<8x128xf32, #tpu.memory_space<vmem>>, vector<8x128xf32>
      tpu.vector_store %arg8[%c0_24, %c0_25], %27 {strides = array<i32>} : memref<8x128xf32, #tpu.memory_space<vmem>>, vector<8x128xf32>,
    } else {
    }
    return
  }
  func.func @transform_0(%arg0: i32, %arg1: i32, %arg2: i32) -> (i32, i32) {
    %c0_i32 = arith.constant 0 : i32
    return %arg0, %arg2 : i32, i32
  }
  func.func @transform_1(%arg0: i32, %arg1: i32, %arg2: i32) -> (i32, i32) {
    %c0_i32 = arith.constant 0 : i32
    return %arg2, %arg1 : i32, i32
  }
  func.func @transform_2(%arg0: i32, %arg1: i32, %arg2: i32) -> (i32, i32) {
    %c1_i32 = arith.constant 1 : i32
    %0 = arith.addi %arg1, %c1_i32 : i32
    %c0_i32 = arith.constant 0 : i32
    return %arg2, %0 : i32, i32
  }
  func.func @transform_3(%arg0: i32, %arg1: i32, %arg2: i32) -> (i32, i32) {
    %c0_i32 = arith.constant 0 : i32
    %c0_i32_0 = arith.constant 0 : i32
    return %c0_i32, %arg1 : i32, i32
  }
  func.func @transform_4(%arg0: i32, %arg1: i32, %arg2: i32) -> (i32, i32) {
    %c1_i32 = arith.constant 1 : i32
    %0 = arith.addi %arg1, %c1_i32 : i32
    %c0_i32 = arith.constant 0 : i32
    %c0_i32_0 = arith.constant 0 : i32
    return %c0_i32, %0 : i32, i32
  }
  func.func @transform_5(%arg0: i32, %arg1: i32, %arg2: i32) -> (i32, i32) {
    %c0_i32 = arith.constant 0 : i32
    return %arg0, %arg1 : i32, i32
  }
}

</mosaic_0001>

<bundles_post_ra>
// kernel: tpu_custom_call.1
= control target key start
LH: loop header
LB: loop body
LE: loop exit
PB: predicated region body
PF: predicated region fallthrough
CT: control target
= control target key end

     0   :  { %10 = vsyncpa [#allocation5], 0  ;;  %s1486_s0 = inlined_call_operand.hbm [shape: f32[16,128], index: 0, kind: input, shape index: {}]   ;;  %s1487_s1 = inlined_call_operand.hbm [shape: f32[128,256], index: 1, kind: input, shape index: {}]   ;;  %s1488_s2 = inlined_call_operand.hbm [shape: f32[128,256], index: 2, kind: input, shape index: {}]   ;;  %s1489_s3 = inlined_call_operand.vmem [shape: f32[1,256], index: 3, kind: input, shape index: {}]   ;;  %s1490_s4 = inlined_call_operand.vmem [shape: f32[1,256], index: 4, kind: input, shape index: {}]   ;;  %s1491_s5 = inlined_call_operand.hbm [shape: f32[16,128], index: 5, kind: output, shape index: {}]  }
   0x1   :  { %12 = vsyncpa [#allocation5 + $0x1], 0 }
   0x2   :  { %13 = vsyncpa [#allocation8], 0 }
   0x3   :  { %14 = vsyncpa [#allocation6], 0 }
   0x4   :  { %16 = vsyncpa [#allocation6 + $0x1], 0  ;;  %s1201_s18 = smov 0   ;;  %s1203_s19 = smov 0  }
   0x5   :  { %s1205_s20 = smov 0   ;;  %s1207_s21 = smov 0  }
   0x6   :  { %s1209_s22 = smov 0   ;;  %s1211_s23 = smov 0  }
   0x7 LB: > { %s1495_s24 = sadd.s32 4294967295, %s1159_s23   ;;  %p721_p0 = scmp.ge.s32.totalorder %s1159_s23, 1  ;;  %s1159_s23 = sphi %s1211_s23, %s22_s23   ;;  %s1155_s22 = sphi %s1209_s22, %s1516_s22   ;;  %s1151_s21 = sphi %s1207_s21, %s1515_s21   ;;  %s1147_s20 = sphi %s1205_s20, %s1514_s20   ;;  %s1143_s19 = sphi %s1203_s19, %s1513_s19   ;;  %s1139_s18 = sphi %s1201_s18, %s1512_s18  }
   0x8   : > { %p1235_p1 = scmp.eq.s32.totalorder %s1495_s24, 0  ;;  %p214_p2 = scmp.lt.s32.totalorder %s1159_s23, 3 }
   0x9   : > { %s1161_s27 = smov [#allocation7]   ;;  %s1258_s7 = scalar_lea.hbm %s1488_s2, 128 }
   0xa   : > { %s1497_s25 = scalar_select %p1235_p1, 1, 0 }
   0xb   : > { %p1240_p3 = pnand %p721_p0, %p214_p2  ;;  %s231_s28 = sshll.u32 %s1161_s27, 4  ;;  %s1244_s28 = int_to_ptr.vmem [resolvable:$true] %s231_s28 }
   0xc   : > { %s1162_s8 = smov [#allocation9]   ;;  %s984_s12 = scalar_lea.hbm %s1487_s1, 2048 }
   0xd   : > { %s1498_s26 = scalar_select %p1240_p3, 1, 0 }
   0xe   : > { %p905_p4 = pneg %p1240_p3  ;;  %s250_s9 = sshll.u32 %s1162_s8, 4  ;;  %s251_s9 = int_to_ptr.vmem [resolvable:$true] %s250_s9 }
   0xf   : > { %p985_p7 = scmp.ne.s32.totalorder %s1487_s1, %s984_s12  ;;  %s989_s17 = scalar_lea.hbm %s1487_s1, 4096 }
  0x10   : > { %p1251_p6 = pnand %p905_p4, %p1235_p1  ;;  %p990_p11 = scmp.lt.u32.totalorder %s989_s17, %s984_s12 }
  0x11   : > { %p991_p12 = scmp.lt.u32.totalorder %s984_s12, %s1487_s1 }
  0x12   : > { %p986_p8 = pneg %p1251_p6 }
  0x13   : > { %p992_p13 = por %p991_p12, %p990_p11 }
  0x14   : > { %p987_p9 = pnand %p986_p8, %p985_p7 }
  0x16   : > { %p988_p10 = pneg %p987_p9 }
  0x18   : > { %p993_p0 = pnand %p992_p13, %p988_p10 }
  0x1a   : > { %996 = shalt.err (!%p993_p0)
}
  0x1b   : > { %s997_s6 = scalar_lea.vmem %s1244_s28, 2048  ;;  %p1005_p9 = scmp.lt.s32.totalorder %s1244_s28, %s1244_s28 }
  0x1c   : > { %p998_p2 = scmp.ne.s32.totalorder %s1244_s28, %s997_s6  ;;  %p1006_p5 = scmp.lt.s32.totalorder %s997_s6, %s997_s6 }
  0x1e   : > { %p1000_p4 = pnand %p998_p2, %p986_p8  ;;  %p1007_p3 = por %p1006_p5, %p1005_p9 }
  0x20   : > { %p1001_p7 = pneg %p1000_p4 }
  0x22   : > { %p1008_p1 = pnand %p1007_p3, %p1001_p7 }
  0x24   : > { %1011 = shalt.err (!%p1008_p1)
}
  0x25   : > { %s1163_s8 = smov 256   ;;  %s1164_s10 = smov 128  }
  0x26   : > { %s1165_s11 = smov 8   ;;  %s1042_s16 = scalar_lea.hbm %s1488_s2, 2176 }
  0x27   : > { %908 = dma.hbm_to_vmem [thread:$0]  (!%p1251_p6), %s1487_s1, 2048, %s1244_s28, [#allocation8], %s1163_s8, %s1164_s10, %s1165_s11  }
  0x28   : > { %p1013_p1 = scmp.ne.s32.totalorder %s1258_s7, %s1042_s16  ;;  %s1017_s30 = scalar_lea.hbm %s1488_s2, 4096 }
  0x29   : > { %p1018_p10 = scmp.lt.u32.totalorder %s1258_s7, %s1488_s2  ;;  %p1019_p11 = scmp.lt.u32.totalorder %s1017_s30, %s1042_s16 }
  0x2a   : > { %p1015_p3 = pnand %p1013_p1, %p986_p8  ;;  %p1021_p13 = scmp.lt.u32.totalorder %s1042_s16, %s1258_s7 }
  0x2b   : > { %p1020_p12 = por %p1019_p11, %p1018_p10 }
  0x2c   : > { %p1016_p5 = pneg %p1015_p3 }
  0x2d   : > { %p1022_p0 = por %p1021_p13, %p1020_p12 }
  0x2f   : > { %p1023_p2 = pnand %p1022_p0, %p1016_p5 }
  0x31   : > { %1026 = shalt.err (!%p1023_p2)
}
  0x32   : > { %s1027_s28 = scalar_lea.vmem %s251_s9, 2048  ;;  %p1035_p1 = scmp.lt.s32.totalorder %s251_s9, %s251_s9 }
  0x33   : > { %p1028_p4 = scmp.ne.s32.totalorder %s251_s9, %s1027_s28  ;;  %p1036_p3 = scmp.lt.s32.totalorder %s1027_s28, %s1027_s28 }
  0x35   : > { %p1030_p7 = pnand %p1028_p4, %p986_p8  ;;  %p1037_p10 = por %p1036_p3, %p1035_p1 }
  0x37   : > { %p1031_p9 = pneg %p1030_p7 }
  0x39   : > { %p1038_p11 = pnand %p1037_p10, %p1031_p9 }
  0x3b   : > { %1041 = shalt.err (!%p1038_p11)
}
  0x3c   : > { %911 = dma.hbm_to_vmem [thread:$0]  (!%p1251_p6), %s1258_s7, 2048, %s251_s9, [#allocation8], %s1163_s8, %s1164_s10, %s1165_s11  }
  0x3d   : > { %s720_s24 = sadd.s32 4294967294, %s1159_s23   ;;  %s41_s12 = sadd.s32 1, %s1155_s22 }
  0x3e   : > { %p43_p8 = scmp.ge.s32.totalorder %s41_s12, 2  ;;  %s50_s29 = sadd.s32 1, %s1147_s20 }
  0x3f   : > { %p57_p5 = scmp.ne.s32.totalorder %s1147_s20, %s1143_s19  ;;  %p58_p12 = scmp.eq.s32.totalorder %s1159_s23, 0 }
  0x40   : > { %s1518_s12 = smov (%p43_p8, %s41_s12), 0  ;;  %p63_p0 = scmp.ne.s32.totalorder %s1143_s19, %s1139_s18 }
  0x41   : > { %p1321_p13 = por %p58_p12, %p57_p5  ;;  %s45_s7 = ssub.s32 %s1155_s22, %s1518_s12 }
  0x42   : > { %s1501_s9 = sadd.s32 4294967295, %s1159_s23   ;;  %p48_p2 = scmp.eq.s32.totalorder %s45_s7, 0 }
  0x43   : > { %p201_p6 = scmp.eq.s32.totalorder %s1501_s9, 1  ;;  %p1502_p4 = scmp.ne.s32.totalorder %s1497_s25, 0 }
  0x44   : > { %p207_p1 = scmp.eq.s32.totalorder %s720_s24, 1  ;;  %p922_p10 = scmp.lt.s32.totalorder %s1159_s23, 2 }
  0x45   : > { %p1333_p7 = por %p1502_p4, %p63_p0  ;;  %p1337_p9 = por %p201_p6, %p57_p5 }
  0x46   : > { %s1342_s11 = scalar_select %p48_p2, %s1147_s20, %s50_s29  }
  0x47   : > { %s1504_s10 = scalar_select %p1337_p9, 1, 0 }
  0x48   : > { %p1344_p3 = por %p207_p1, %p63_p0  ;;  %s278_s15 = sand.u32 1, %s1147_s20  }
  0x49   : > { %s728_s16 = sshll.u32 %s1155_s22, 7  ;;  %s727_s17 = sshll.u32 %s278_s15, 3 }
  0x4a   : > { %s1505_s14 = scalar_select %p1344_p3, 1, 0 }
  0x4b   : > { %s1354_s6 = scalar_lea.hbm %s1486_s0, %s728_s16  ;;  %s282_s28 = scalar_lea.vmem [#allocation4], %s727_s17 }
  0x4c   : > { %s290_s24 = sshll.u32 %s282_s28, 4  ;;  %p1358_p11 = pnand %p922_p10, %p1321_p13  ;;  %s1362_s24 = int_to_ptr.vmem [resolvable:$true] %s290_s24 }
  0x4d   : > { %s279_s7 = scalar_lea.sflag [#allocation5], %s278_s15  ;;  %s1043_s9 = scalar_lea.hbm %s1354_s6, 128 }
  0x4e   : > { %p1044_p8 = scmp.ne.s32.totalorder %s1354_s6, %s1043_s9  ;;  %p1045_p5 = pneg %p1358_p11 }
  0x4f   : > { %s1048_s13 = scalar_lea.hbm %s1486_s0, 256  ;;  %p1049_p13 = scmp.lt.u32.totalorder %s1354_s6, %s1486_s0 }
  0x50   : > { %p1046_p12 = pnand %p1045_p5, %p1044_p8  ;;  %p1050_p6 = scmp.lt.u32.totalorder %s1048_s13, %s1043_s9 }
  0x51   : > { %p1052_p4 = scmp.lt.u32.totalorder %s1043_s9, %s1354_s6 }
  0x52   : > { %p1047_p0 = pneg %p1046_p12  ;;  %p1051_p2 = por %p1050_p6, %p1049_p13 }
  0x54   : > { %p1053_p1 = por %p1052_p4, %p1051_p2 }
  0x56   : > { %p1054_p10 = pnand %p1053_p1, %p1047_p0 }
  0x58   : > { %1057 = shalt.err (!%p1054_p10)
}
  0x59   : > { %s1058_s15 = scalar_lea.vmem %s1362_s24, 128  ;;  %s1166_s28 = smov [#allocation4]  }
  0x5a   : > { %p1059_p8 = scmp.ne.s32.totalorder %s1362_s24, %s1058_s15  ;;  %s1063_s16 = sshll.u32 %s1166_s28, 4  ;;  %s1064_s16 = int_to_ptr.vmem [resolvable:$false] %s1063_s16 }
  0x5b   : > { %s1065_s17 = scalar_lea.vmem %s1064_s16, 256  ;;  %p1066_p9 = scmp.lt.s32.totalorder %s1362_s24, %s1064_s16 }
  0x5c   : > { %p1061_p12 = pnand %p1059_p8, %p1045_p5  ;;  %p1067_p13 = scmp.lt.s32.totalorder %s1065_s17, %s1058_s15 }
  0x5e   : > { %p1062_p3 = pneg %p1061_p12  ;;  %p1068_p6 = por %p1067_p13, %p1066_p9 }
  0x60   : > { %p1069_p2 = pnand %p1068_p6, %p1062_p3 }
  0x62   : > { %1072 = shalt.err (!%p1069_p2)
}
  0x63   : > { %915 = dma.hbm_to_vmem [thread:$0]  (!%p1358_p11), %s1354_s6, 128, %s1362_s24, %s279_s7  }
  0x64   : > { %p1507_p0 = scmp.ne.s32.totalorder %s1498_s26, 0 }
  0x65   : > { %s1392_s9 = sand.u32 (!%p1507_p0), 1, %s1143_s19  }
  0x66   : > { %299 = sbr.rel (%p1507_p0) target bundleno = 395 (0x18b), region = 40  ;;  %s730_s13 = sshll.u32 (!%p1507_p0), %s1392_s9, 3 }
  0x67   : > { %s302_s27 = scalar_lea.sflag (!%p1507_p0), [#allocation5], %s1392_s9  ;;  %s1398_s30 = scalar_lea.vmem (!%p1507_p0), [#allocation4], %s730_s13 }
  0x6d   : > { %1126 = dma.done.wait (%p1333_p7), %s302_s27, 128  }
  0x6e   : > { %1128 = vsyncadd (%p1333_p7), %s302_s27, 4294967168  ;;  %p1508_p9 = scmp.ne.s32.totalorder %s1497_s25, 0 }
  0x70   : > { %1130 = dma.done.wait (%p1508_p9), [#allocation8], 4096  }
  0x71   : > { %1132 = vsyncadd (%p1508_p9), [#allocation8], 4294963200  ;;  %v1167_v0 = vmov 0.0|0.0   ;;  %vm1168_vm0 = vmmov 0   ;;  %v1169_v1 = vmov 0.0   ;;  %v395_v2 = vld [vmem:[#allocation9] sm:$0xff] }
  0x72   : > { %869 = vmatprep.subr.bf16.mxu1 %v1167_v0  ;;  %845 = vmatprep.subr.bf16.mxu0 %v1167_v0  ;;  %v396_v3 = vld [vmem:[#allocation9 + $0x8] sm:$0xff]  ;;  %v397_v4 = vld [vmem:[#allocation9 + $0x10] sm:$0xff]  ;;  %v398_v6 = vld [vmem:[#allocation9 + $0x18] sm:$0xff]  ;;  %s738_s24 = sshll.u32 %s1151_s21, 7  ;;  %s346_s29 = scalar_lea.vmem [#allocation10], %s730_s13 }
  0x73   : > { %842 = vmatprep.mubr.msk.f32.mxu1 %vm1168_vm0, %v1169_v1  ;;  %807 = vmatprep.mubr.msk.f32.mxu0 %vm1168_vm0, %v1169_v1  ;;  %v870_v5 = vpack.c.bf16 %v396_v3, %v395_v2  ;;  %v379_v7 = vld [vmem:[#allocation7] sm:$0xff]  ;;  %v873_v8 = vpack.c.bf16 %v398_v6, %v397_v4  ;;  %v380_v10 = vld [vmem:[#allocation7 + $0x8] sm:$0xff]  ;;  %v381_v13 = vld [vmem:[#allocation7 + $0x10] sm:$0xff]  ;;  %s584_s7 = sshll.u32 %s346_s29, 4  ;;  %s1437_s16 = scalar_lea.hbm %s1491_s5, %s738_s24  ;;  %s1439_s7 = int_to_ptr.vmem [resolvable:$true] %s584_s7 }
  0x74   : > { %v399_v9 = vld [vmem:[#allocation9 + $0x20] sm:$0xff]  ;;  %v400_v11 = vld [vmem:[#allocation9 + $0x28] sm:$0xff]  ;;  %v846_v12 = vpack.c.bf16 %v380_v10, %v379_v7  ;;  %v382_v14 = vld [vmem:[#allocation7 + $0x18] sm:$0xff]  ;;  %s570_s17 = scalar_lea.sflag [#allocation6], %s1392_s9  ;;  %s1073_s27 = scalar_lea.vmem %s1439_s7, 128 }
  0x75   : > { %871 = vmatpush3.bf16.msra.mxu1 %v870_v5  ;;  %v849_v15 = vpack.c.bf16 %v382_v14, %v381_v13  ;;  %v876_v16 = vpack.c.bf16 %v400_v11, %v399_v9  ;;  %v383_v17 = vld [vmem:[#allocation7 + $0x20] sm:$0xff]  ;;  %v384_v18 = vld [vmem:[#allocation7 + $0x28] sm:$0xff]  ;;  %v401_v19 = vld [vmem:[#allocation9 + $0x30] sm:$0xff]  ;;  %p1074_p7 = scmp.ne.s32.totalorder %s1439_s7, %s1073_s27  ;;  %p1509_p3 = scmp.ne.s32.totalorder %s1504_s10, 0 }
  0x76   : > { %872 = vmatprep.subr.bf16.mxu1 %v1167_v0  ;;  %847 = vmatpush3.bf16.msra.mxu0 %v846_v12  ;;  %v402_v20 = vld [vmem:[#allocation9 + $0x38] sm:$0xff]  ;;  %v852_v21 = vpack.c.bf16 %v384_v18, %v383_v17  ;;  %v385_v23 = vld [vmem:[#allocation7 + $0x30] sm:$0xff]  ;;  %v403_v25 = vld [vmem:[#allocation9 + $0x40] sm:$0xff]  ;;  %s1170_s21 = smov [#allocation10]  }
  0x77   : > { %848 = vmatprep.subr.bf16.mxu0 %v1167_v0  ;;  %v879_v22 = vpack.c.bf16 %v402_v20, %v401_v19  ;;  %v386_v24 = vld [vmem:[#allocation7 + $0x38] sm:$0xff]  ;;  %v404_v26 = vld [vmem:[#allocation9 + $0x48] sm:$0xff]  ;;  %v387_v29 = vld [vmem:[#allocation7 + $0x40] sm:$0xff]  ;;  %p1075_p11 = pnand %p1074_p7, %p1509_p3  ;;  %s1077_s13 = sshll.u32 %s1170_s21, 4  ;;  %s1078_s13 = int_to_ptr.vmem [resolvable:$false] %s1077_s13 }
  0x78   : > { %v855_v27 = vpack.c.bf16 %v386_v24, %v385_v23  ;;  %v882_v28 = vpack.c.bf16 %v404_v26, %v403_v25  ;;  %v388_v30 = vld [vmem:[#allocation7 + $0x48] sm:$0xff]  ;;  %v405_v31 = vld [vmem:[#allocation9 + $0x50] sm:$0xff]  ;;  %v406_v32 = vld [vmem:[#allocation9 + $0x58] sm:$0xff]  ;;  %p1080_p4 = scmp.lt.s32.totalorder %s1439_s7, %s1078_s13 }
  0x79   : > { %874 = vmatpush3.bf16.msra.mxu1 %v873_v8  ;;  %v858_v33 = vpack.c.bf16 %v388_v30, %v387_v29  ;;  %v885_v34 = vpack.c.bf16 %v406_v32, %v405_v31  ;;  %v389_v35 = vld [vmem:[#allocation7 + $0x50] sm:$0xff]  ;;  %v390_v36 = vld [vmem:[#allocation7 + $0x58] sm:$0xff]  ;;  %v407_v37 = vld [vmem:[#allocation9 + $0x60] sm:$0xff]  ;;  %p1076_p5 = pneg %p1075_p11 }
  0x7a   : > { %875 = vmatprep.subr.bf16.mxu1 %v1167_v0  ;;  %850 = vmatpush3.bf16.msra.mxu0 %v849_v15  ;;  %v408_v38 = vld [vmem:[#allocation9 + $0x68] sm:$0xff]  ;;  %v861_v39 = vpack.c.bf16 %v390_v36, %v389_v35  ;;  %v391_v41 = vld [vmem:[#allocation7 + $0x60] sm:$0xff]  ;;  %v409_v43 = vld [vmem:[#allocation9 + $0x70] sm:$0xff] }
  0x7b   : > { %851 = vmatprep.subr.bf16.mxu0 %v1167_v0  ;;  %v888_v40 = vpack.c.bf16 %v408_v38, %v407_v37  ;;  %v392_v42 = vld [vmem:[#allocation7 + $0x68] sm:$0xff]  ;;  %v410_v44 = vld [vmem:[#allocation9 + $0x78] sm:$0xff]  ;;  %v393_v47 = vld [vmem:[#allocation7 + $0x70] sm:$0xff] }
  0x7c   : > { %v864_v45 = vpack.c.bf16 %v392_v42, %v391_v41  ;;  %v891_v46 = vpack.c.bf16 %v410_v44, %v409_v43  ;;  %v394_v48 = vld [vmem:[#allocation7 + $0x78] sm:$0xff]  ;;  %v736_v51 = vld [vmem:[%s1490_s4 + $0x1] ss:$0 sm:$0xff]  ;;  %v734_v58 = vld [vmem:[%s1489_s3] ss:$0 sm:$0xff] }
  0x7d   : > { %877 = vmatpush3.bf16.msra.mxu1 %v876_v16  ;;  %v867_v49 = vpack.c.bf16 %v394_v48, %v393_v47  ;;  %v378_v50 = vld [vmem:[%s1398_s30] sm:$0xff]  ;;  %s1079_s30 = scalar_lea.vmem %s1078_s13, 256 }
  0x7e   : > { %878 = vmatprep.subr.bf16.mxu1 %v1167_v0  ;;  %853 = vmatpush3.bf16.msra.mxu0 %v852_v21  ;;  %p1081_p1 = scmp.lt.s32.totalorder %s1079_s30, %s1073_s27 }
  0x7f   : > { %854 = vmatprep.subr.bf16.mxu0 %v1167_v0 }
  0x80   : > { %p1082_p10 = por %p1081_p1, %p1080_p4 }
  0x81   : > { %880 = vmatpush3.bf16.msra.mxu1 %v879_v22 }
  0x82   : > { %881 = vmatprep.subr.bf16.mxu1 %v1167_v0  ;;  %856 = vmatpush3.bf16.msra.mxu0 %v855_v27  ;;  %p1083_p8 = pnand %p1082_p10, %p1076_p5 }
  0x83   : > { %857 = vmatprep.subr.bf16.mxu0 %v1167_v0 }
  0x85   : > { %883 = vmatpush3.bf16.msra.mxu1 %v882_v28 }
  0x86   : > { %884 = vmatprep.subr.bf16.mxu1 %v1167_v0  ;;  %859 = vmatpush3.bf16.msra.mxu0 %v858_v33 }
  0x87   : > { %860 = vmatprep.subr.bf16.mxu0 %v1167_v0 }
  0x89   : > { %886 = vmatpush3.bf16.msra.mxu1 %v885_v34 }
  0x8a   : > { %887 = vmatprep.subr.bf16.mxu1 %v1167_v0  ;;  %862 = vmatpush3.bf16.msra.mxu0 %v861_v39 }
  0x8b   : > { %863 = vmatprep.subr.bf16.mxu0 %v1167_v0 }
  0x8d   : > { %889 = vmatpush3.bf16.msra.mxu1 %v888_v40 }
  0x8e   : > { %890 = vmatprep.subr.bf16.mxu1 %v1167_v0  ;;  %865 = vmatpush3.bf16.msra.mxu0 %v864_v45 }
  0x8f   : > { %866 = vmatprep.subr.bf16.mxu0 %v1167_v0 }
  0x91   : > { %892 = vmatpush3.bf16.msra.mxu1 %v891_v46 }
  0x92   : > { %868 = vmatpush3.bf16.msra.mxu0 %v867_v49 }
  0x94   : > { %843 = vmatmul.mubr.f32.vlgmr.msra.gmra.mrb[0].mxu1 %v378_v50 }
  0x95   : > { %808 = vmatmul.mubr.f32.vlgmr.msra.gmra.mrb[0].mxu0 %v378_v50 }
 0x167   : > { %v551_v52 = vpop.f32.mrb[0].mxu1 }
 0x168   : > { %v555_v53 = vadd.f32 %v736_v51, %v551_v52  ;;  %v844_v54 = vpop.f32.mrb[1].mxu1  ;;  %v478_v56 = vpop.f32.mrb[0].mxu0 }
 0x169   : > { %v809_v57 = vpop.f32.mrb[1].mxu0  ;;  %v482_v62 = vadd.f32 %v734_v58, %v478_v56 }
 0x16a   : > { %v562_v55 = vmul.f32 0.70710677, %v555_v53  ;;  %v561_v60 = vmul.f32 0.5, %v555_v53 }
 0x16c   : > { %982 = verf.f32 %v562_v55 }
 0x176   : > { %v983_v59 = vpop.eup %982 }
 0x177   : > { %v564_v61 = vadd.f32 1.0, %v983_v59 }
 0x179   : > { %v565_v63 = vmul.f32 %v564_v61, %v561_v60 }
 0x17b   : > { %v567_v0 = vmul.f32 %v565_v63, %v482_v62 }
 0x17d   : > { %568 = vst [vmem:[%s346_s29] sm:$0xff] %v567_v0 }
 0x17e   : > { %1086 = shalt.err (!%p1083_p8)
}
 0x17f   : > { %s1087_s9 = scalar_lea.hbm %s1437_s16, 128  ;;  %s1091_s8 = scalar_lea.hbm %s1491_s5, 256 }
 0x180   : > { %p1088_p12 = scmp.ne.s32.totalorder %s1437_s16, %s1087_s9  ;;  %p1092_p2 = scmp.lt.u32.totalorder %s1437_s16, %s1491_s5 }
 0x181   : > { %p1093_p0 = scmp.lt.u32.totalorder %s1091_s8, %s1087_s9  ;;  %p1095_p7 = scmp.lt.u32.totalorder %s1087_s9, %s1437_s16 }
 0x182   : > { %p1089_p13 = pnand %p1088_p12, %p1509_p3 }
 0x183   : > { %p1094_p9 = por %p1093_p0, %p1092_p2 }
 0x184   : > { %p1090_p6 = pneg %p1089_p13 }
 0x185   : > { %p1096_p11 = por %p1095_p7, %p1094_p9 }
 0x187   : > { %p1097_p5 = pnand %p1096_p11, %p1090_p6 }
 0x189   : > { %1100 = shalt.err (!%p1097_p5)
}
 0x18a   : > { %903 = dma.vmem_to_hbm [thread:$0]  (%p1509_p3), %s1439_s7, 128, %s1437_s16, %s570_s17  }
 0x18b PF: > { %s596_s29 = sand.u32 1, %s1139_s18   ;;  %p1510_p4 = scmp.ne.s32.totalorder %s1505_s14, 0 }
 0x18c   : > { %p1511_p1 = scmp.ge.s32.totalorder %s1159_s23, 2  ;;  %s597_s15 = scalar_lea.sflag [#allocation6], %s596_s29 }
 0x18e   : > { %p917_p10 = pnand %p1511_p1, %p1510_p4 }
 0x190   : > { %1134 = dma.done.wait (!%p917_p10), %s597_s15, 128  }
 0x191   : > { %1136 = vsyncadd (!%p917_p10), %s597_s15, 4294967168  ;;  %s22_s23 = sadd.s32 1, %s1159_s23   ;;  %s1512_s18 = smov %s1143_s19 }
 0x192   : > { %p19_p8 = scmp.ge.s32.totalorder %s22_s23, 4   ;;  %s1513_s19 = smov %s1147_s20 }
 0x193   : > { %s1514_s20 = smov %s1342_s11  ;;  %s1515_s21 = smov %s1155_s22 }
 0x194   : > { %s1516_s22 = smov %s1518_s12  ;;  %21 = sbr.rel (!%p19_p8) target bundleno = 7 (0x7), region = 109 }
 0x19b   :  { %602 = vsyncpa [#allocation5], 1 }
 0x19c   :  { %604 = vsyncpa [#allocation5 + $0x1], 1 }
 0x19d   :  { %605 = vsyncpa [#allocation8], 1 }
 0x19e   :  { %606 = vsyncpa [#allocation6], 1 }
 0x19f   :  { %608 = vsyncpa [#allocation6 + $0x1], 1 }

</bundles_post_ra>
